<compile_context>
chip_gen: v6e
topology: v6e:2x2x1
jax: 0.10.0
libtpu: 0.0.40
codegen_flags: <defaults>
</compile_context>

<pallas_src>
from functools import partial

import jax
import jax.numpy as jnp
from jax.experimental import pallas as pl
from jax.experimental.pallas import tpu as pltpu


def _round_up(x, m):
    return (x + m - 1) // m * m


def _task_branch_kernel(x_ref, w1_ref, b1_ref, w2_ref, b2_ref, o_ref):
    # x: (TB, Din), w1: (Din, H), b1: (1, H), w2: (H, O_pad), b2: (1, O_pad)
    x = x_ref[...]

    # fc1 + ReLU
    h = jnp.dot(x, w1_ref[...], preferred_element_type=jnp.float32) + b1_ref[...]
    h = jnp.maximum(h, 0.0)

    # BN(eval) folded into w2/b2; Dropout(eval) == identity.
    # fc2 + Sigmoid (exp + approx reciprocal both land on the EUP).
    y = jnp.dot(h, w2_ref[...], preferred_element_type=jnp.float32) + b2_ref[...]
    o_ref[...] = pl.reciprocal(1.0 + jnp.exp(-y), approx=True).astype(o_ref.dtype)


def prepare_params(params, eps=1e-5):
    """One-time (outside hot path): transpose weights, fold BN into fc2,
    pad the output lane dim to a multiple of 128 for lane-dense stores."""
    w1_t = jnp.asarray(params["w1"]).T                       # (Din, H)
    b1 = jnp.asarray(params["b1"])[None, :]                  # (1, H)

    inv_std = 1.0 / jnp.sqrt(params["bn_var"] + eps)
    scale = params["bn_gamma"] * inv_std                     # (H,)
    shift = params["bn_beta"] - params["bn_mean"] * scale    # (H,)

    w2_t = jnp.asarray(params["w2"]).T                       # (H, O)
    w2_eff = w2_t * scale[:, None]                           # fold BN scale
    b2_eff = shift @ w2_t + params["b2"]                     # fold BN shift

    out_nodes = w2_eff.shape[1]
    o_pad = _round_up(max(out_nodes, 128), 128)
    w2_p = jnp.zeros((w2_eff.shape[0], o_pad), jnp.float32).at[:, :out_nodes].set(w2_eff)
    b2_p = jnp.zeros((1, o_pad), jnp.float32).at[:, :out_nodes].set(b2_eff)

    prepared = dict(w1_t=w1_t.astype(jnp.float32), b1=b1.astype(jnp.float32),
                    w2=w2_p, b2=b2_p)
    return prepared, out_nodes


@partial(jax.jit, static_argnames=("out_nodes",))
def task_branch_attributes(x, prepared, *, out_nodes):
    """x: (B, in_nodes) float32. prepared: output of prepare_params."""
    B, d_in = x.shape
    H = prepared["w1_t"].shape[1]
    o_pad = prepared["w2"].shape[1]

    # Batch tiling: big row tiles (pipelined + double-buffered), min 8 sublanes.
    tb = min(512, _round_up(B, 8))
    b_pad = _round_up(B, tb)
    if b_pad != B:
        x = jnp.pad(x, ((0, b_pad - B), (0, 0)))
    grid = (b_pad // tb,)

    cost = pl.CostEstimate(
        flops=2 * b_pad * (d_in * H + H * o_pad),
        transcendentals=2 * b_pad * o_pad,                    # exp + approx recip
        bytes_accessed=4 * (b_pad * d_in + d_in * H + H
                            + H * o_pad + o_pad + b_pad * o_pad),
    )

    out = pl.pallas_call(
        _task_branch_kernel,
        out_shape=jax.ShapeDtypeStruct((b_pad, o_pad), jnp.float32),
        grid_spec=pltpu.PrefetchScalarGridSpec(
            num_scalar_prefetch=0,
            grid=grid,
            in_specs=[
                pl.BlockSpec((tb, d_in), lambda i: (i, 0)),      # x tile
                pl.BlockSpec((d_in, H), lambda i: (0, 0)),       # w1 (resident)
                pl.BlockSpec((1, H), lambda i: (0, 0)),          # b1
                pl.BlockSpec((H, o_pad), lambda i: (0, 0)),      # w2 (BN-folded)
                pl.BlockSpec((1, o_pad), lambda i: (0, 0)),      # b2 (BN-folded)
            ],
            out_specs=pl.BlockSpec((tb, o_pad), lambda i: (i, 0)),
        ),
        compiler_params=pltpu.CompilerParams(
            dimension_semantics=("parallel",),                   # v7x: 2 TCs
        ),
        cost_estimate=cost,
    )(x, prepared["w1_t"], prepared["b1"], prepared["w2"], prepared["b2"])

    return out[:B, :out_nodes]


def init_params(key, in_nodes, hidden_nodes, out_nodes=8):
    ks = jax.random.split(key, 8)
    w1 = jax.random.uniform(ks[0], (hidden_nodes, in_nodes), jnp.float32,
                            -1.0, 1.0) / jnp.sqrt(in_nodes)
    b1 = jax.random.uniform(ks[1], (hidden_nodes,), jnp.float32,
                            -1.0, 1.0) / jnp.sqrt(in_nodes)
    w2 = jax.random.uniform(ks[2], (out_nodes, hidden_nodes), jnp.float32,
                            -1.0, 1.0) / jnp.sqrt(hidden_nodes)
    b2 = jax.random.uniform(ks[3], (out_nodes,), jnp.float32,
                            -1.0, 1.0) / jnp.sqrt(hidden_nodes)
    bn_gamma = 1.0 + 0.1 * jax.random.normal(ks[4], (hidden_nodes,), jnp.float32)
    bn_beta = 0.1 * jax.random.normal(ks[5], (hidden_nodes,), jnp.float32)
    bn_mean = 0.05 * jax.random.normal(ks[6], (hidden_nodes,), jnp.float32)
    bn_var = 1.0 + 0.1 * jax.random.uniform(ks[7], (hidden_nodes,), jnp.float32)
    return dict(w1=w1, b1=b1, w2=w2, b2=b2, bn_gamma=bn_gamma, bn_beta=bn_beta,
                bn_mean=bn_mean, bn_var=bn_var)


def reference(x, p, eps=1e-5):
    h = jnp.maximum(x @ p["w1"].T + p["b1"], 0.0)
    h = (h - p["bn_mean"]) / jnp.sqrt(p["bn_var"] + eps) * p["bn_gamma"] + p["bn_beta"]
    y = h @ p["w2"].T + p["b2"]
    return jax.nn.sigmoid(y)


if __name__ == "__main__":
    key = jax.random.PRNGKey(0)
    k_x, k_p = jax.random.split(key)

    B, in_nodes, hidden_nodes, out_nodes = 8, 32, 64, 8
    x = jax.random.normal(k_x, (B, in_nodes), jnp.float32)
    params = init_params(k_p, in_nodes, hidden_nodes, out_nodes)

    prepared, o = prepare_params(params)       # one-time, outside hot path
    out = task_branch_attributes(x, prepared, out_nodes=o)
    out = jax.block_until_ready(out)

    ref = reference(x, params)
    assert out.shape == (B, out_nodes)
    # approx reciprocal in the sigmoid -> slightly looser (absolute) tolerance
    assert jnp.max(jnp.abs(out - ref)) < 2e-3, "mismatch vs reference"
    print("KERNEL_OK")
</pallas_src>

<mosaic_0001>
module attributes {stable_mosaic.version = 11 : i64} {
  func.func @_task_branch_kernel(%arg0: i32, %arg1: memref<8x32xf32, #tpu.memory_space<vmem>>, %arg2: memref<32x64xf32, #tpu.memory_space<vmem>>, %arg3: memref<1x64xf32, #tpu.memory_space<vmem>>, %arg4: memref<64x128xf32, #tpu.memory_space<vmem>>, %arg5: memref<1x128xf32, #tpu.memory_space<vmem>>, %arg6: memref<8x128xf32, #tpu.memory_space<vmem>>) attributes {dimension_semantics = [#tpu.dimension_semantics<parallel>], iteration_bounds = array<i64: 1>, scalar_prefetch = 0 : i64, scratch_operands = 0 : i64, tpu.core_type = #tpu.core_type<tc>, window_params = [{transform_indices = @transform_0, window_bounds = array<i64: 8, 32>}, {pipeline_mode = #tpu.pipeline_mode<synchronous>, transform_indices = @transform_1, window_bounds = array<i64: 32, 64>}, {pipeline_mode = #tpu.pipeline_mode<synchronous>, transform_indices = @transform_2, window_bounds = array<i64: 1, 64>}, {pipeline_mode = #tpu.pipeline_mode<synchronous>, transform_indices = @transform_3, window_bounds = array<i64: 64, 128>}, {pipeline_mode = #tpu.pipeline_mode<synchronous>, transform_indices = @transform_4, window_bounds = array<i64: 1, 128>}, {transform_indices = @transform_5, window_bounds = array<i64: 8, 128>}]} {
    %c0 = arith.constant 0 : index
    %c0_0 = arith.constant 0 : index
    %0 = vector.load %arg1[%c0, %c0_0] : memref<8x32xf32, #tpu.memory_space<vmem>>, vector<8x32xf32>
    %c0_1 = arith.constant 0 : index
    %c0_2 = arith.constant 0 : index
    %1 = vector.load %arg2[%c0_1, %c0_2] : memref<32x64xf32, #tpu.memory_space<vmem>>, vector<32x64xf32>
    %cst = arith.constant dense<0.000000e+00> : vector<8x64xf32>
    %2 = tpu.matmul %0, %1, %cst {dimension_numbers = #tpu.dot_dimension_numbers<[1], [0], [0], [1], [0, 0, 1, 1], [], []>} : vector<8x32xf32>, vector<32x64xf32>, vector<8x64xf32> -> vector<8x64xf32>
    %c0_3 = arith.constant 0 : index
    %c0_4 = arith.constant 0 : index
    %3 = vector.load %arg3[%c0_3, %c0_4] : memref<1x64xf32, #tpu.memory_space<vmem>>, vector<1x64xf32>
    %4 = vector.broadcast %3 : vector<1x64xf32> to vector<8x64xf32>
    %5 = arith.addf %2, %4 : vector<8x64xf32>
    %cst_5 = arith.constant 0.000000e+00 : f32
    %6 = vector.broadcast %cst_5 : f32 to vector<8x64xf32>
    %7 = arith.maximumf %5, %6 : vector<8x64xf32>
    %c0_6 = arith.constant 0 : index
    %c0_7 = arith.constant 0 : index
    %8 = vector.load %arg4[%c0_6, %c0_7] : memref<64x128xf32, #tpu.memory_space<vmem>>, vector<64x128xf32>
    %cst_8 = arith.constant dense<0.000000e+00> : vector<8x128xf32>
    %9 = tpu.matmul %7, %8, %cst_8 {dimension_numbers = #tpu.dot_dimension_numbers<[1], [0], [0], [1], [0, 0, 1, 1], [], []>} : vector<8x64xf32>, vector<64x128xf32>, vector<8x128xf32> -> vector<8x128xf32>
    %c0_9 = arith.constant 0 : index
    %c0_10 = arith.constant 0 : index
    %10 = vector.load %arg5[%c0_9, %c0_10] : memref<1x128xf32, #tpu.memory_space<vmem>>, vector<1x128xf32>
    %11 = vector.broadcast %10 : vector<1x128xf32> to vector<8x128xf32>
    %12 = arith.addf %9, %11 : vector<8x128xf32>
    %cst_11 = arith.constant 0.000000e+00 : f32
    %13 = vector.broadcast %cst_11 : f32 to vector<8x128xf32>
    %14 = arith.subf %13, %12 : vector<8x128xf32>
    %15 = math.exp %14 : vector<8x128xf32>
    %cst_12 = arith.constant 1.000000e+00 : f32
    %16 = vector.broadcast %cst_12 : f32 to vector<8x128xf32>
    %17 = arith.addf %16, %15 : vector<8x128xf32>
    %18 = tpu.reciprocal %17 {approx = true} : vector<8x128xf32> -> vector<8x128xf32>
    %c0_13 = arith.constant 0 : index
    %c0_14 = arith.constant 0 : index
    %19 = vector.load %arg6[%c0_13, %c0_14] : memref<8x128xf32, #tpu.memory_space<vmem>>, vector<8x128xf32>
    tpu.vector_store %arg6[%c0_13, %c0_14], %18 {strides = array<i32>} : memref<8x128xf32, #tpu.memory_space<vmem>>, vector<8x128xf32>,
    return
  }
  func.func @transform_0(%arg0: i32) -> (i32, i32) {
    %c0_i32 = arith.constant 0 : i32
    %c0_i32_0 = arith.constant 0 : i32
    return %arg0, %c0_i32 : i32, i32
  }
  func.func @transform_1(%arg0: i32) -> (i32, i32) {
    %c0_i32 = arith.constant 0 : i32
    %c0_i32_0 = arith.constant 0 : i32
    %c0_i32_1 = arith.constant 0 : i32
    return %c0_i32, %c0_i32_0 : i32, i32
  }
  func.func @transform_2(%arg0: i32) -> (i32, i32) {
    %c0_i32 = arith.constant 0 : i32
    %c0_i32_0 = arith.constant 0 : i32
    %c0_i32_1 = arith.constant 0 : i32
    return %c0_i32, %c0_i32_0 : i32, i32
  }
  func.func @transform_3(%arg0: i32) -> (i32, i32) {
    %c0_i32 = arith.constant 0 : i32
    %c0_i32_0 = arith.constant 0 : i32
    %c0_i32_1 = arith.constant 0 : i32
    return %c0_i32, %c0_i32_0 : i32, i32
  }
  func.func @transform_4(%arg0: i32) -> (i32, i32) {
    %c0_i32 = arith.constant 0 : i32
    %c0_i32_0 = arith.constant 0 : i32
    %c0_i32_1 = arith.constant 0 : i32
    return %c0_i32, %c0_i32_0 : i32, i32
  }
  func.func @transform_5(%arg0: i32) -> (i32, i32) {
    %c0_i32 = arith.constant 0 : i32
    %c0_i32_0 = arith.constant 0 : i32
    return %arg0, %c0_i32 : i32, i32
  }
}

</mosaic_0001>

<bundles_post_ra>
// kernel: task_branch_attributes.1
= control target key start
LH: loop header
LB: loop body
LE: loop exit
PB: predicated region body
PF: predicated region fallthrough
CT: control target
= control target key end

     0   :  { %10 = vsyncpa [#allocation3], 0  ;;  %s460_s0 = inlined_call_operand.hbm [shape: f32[8,32], index: 0, kind: input, shape index: {}]   ;;  %s461_s1 = inlined_call_operand.hbm [shape: f32[32,64], index: 1, kind: input, shape index: {}]   ;;  %s462_s2 = inlined_call_operand.vmem [shape: f32[1,64], index: 2, kind: input, shape index: {}]   ;;  %s463_s3 = inlined_call_operand.hbm [shape: f32[64,128], index: 3, kind: input, shape index: {}]   ;;  %s464_s4 = inlined_call_operand.vmem [shape: f32[1,128], index: 4, kind: input, shape index: {}]   ;;  %s465_s5 = inlined_call_operand.hbm [shape: f32[8,128], index: 5, kind: output, shape index: {}]  }
   0x1   :  { %11 = vsyncpa [#allocation6], 0 }
   0x2   :  { %12 = vsyncpa [#allocation4], 0  ;;  %s404_s18 = smov [#allocation5]  }
   0x3   :  { %s28_s19 = sshll.u32 %s404_s18, 4  ;;  %s29_s19 = int_to_ptr.vmem [resolvable:$true] %s28_s19 }
   0x4   :  { %s326_s20 = scalar_lea.vmem %s29_s19, 512  ;;  %p331_p1 = scmp.lt.s32.totalorder %s29_s19, %s29_s19 }
   0x5   :  { %p327_p0 = scmp.ne.s32.totalorder %s29_s19, %s326_s20  ;;  %p332_p2 = scmp.lt.s32.totalorder %s326_s20, %s326_s20 }
   0x7   :  { %p333_p3 = por %p332_p2, %p331_p1 }
   0x9   :  { %p334_p4 = pnand %p333_p3, %p327_p0 }
   0xb   :  { %337 = shalt.err (!%p334_p4)
}
   0xc   :  { %s405_s21 = smov 128   ;;  %s406_s22 = smov 8  }
   0xd   :  { %34 = dma.hbm_to_vmem [thread:$0]  %s461_s1, 512, %s29_s19, [#allocation6], %s405_s21, %s405_s21, %s406_s22  }
   0xe   :  { %s407_s25 = smov [#allocation2]   ;;  %s408_s27 = smov [#allocation7]  }
   0xf   :  { %s19_s26 = sshll.u32 %s407_s25, 4  ;;  %s42_s28 = sshll.u32 %s408_s27, 4  ;;  %s20_s26 = int_to_ptr.vmem [resolvable:$true] %s19_s26  ;;  %s43_s28 = int_to_ptr.vmem [resolvable:$true] %s42_s28 }
  0x10   :  { %s346_s29 = scalar_lea.vmem %s20_s26, 128  ;;  %p351_p6 = scmp.lt.s32.totalorder %s20_s26, %s20_s26 }
  0x11   :  { %p347_p5 = scmp.ne.s32.totalorder %s20_s26, %s346_s29  ;;  %p352_p7 = scmp.lt.s32.totalorder %s346_s29, %s346_s29 }
  0x13   :  { %p353_p8 = por %p352_p7, %p351_p6 }
  0x15   :  { %p354_p9 = pnand %p353_p8, %p347_p5 }
  0x17   :  { %357 = shalt.err (!%p354_p9)
}
  0x18   :  { %22 = dma.hbm_to_vmem [thread:$0]  %s460_s0, 128, %s20_s26, [#allocation3]  }
  0x19   :  { %s366_s7 = scalar_lea.vmem %s43_s28, 1024  ;;  %p371_p11 = scmp.lt.s32.totalorder %s43_s28, %s43_s28 }
  0x1a   :  { %p367_p10 = scmp.ne.s32.totalorder %s43_s28, %s366_s7  ;;  %p372_p12 = scmp.lt.s32.totalorder %s366_s7, %s366_s7 }
  0x1c   :  { %p373_p13 = por %p372_p12, %p371_p11 }
  0x1e   :  { %p374_p0 = pnand %p373_p13, %p367_p10 }
  0x20   :  { %377 = shalt.err (!%p374_p0)
}
  0x21   :  { %48 = dma.hbm_to_vmem [thread:$0]  %s463_s3, 1024, %s43_s28, [#allocation6], %s405_s21, %s405_s21, %s406_s22  }
  0x22   :  { %398 = dma.done.wait [#allocation3], 128  }
  0x23   :  { %399 = vsyncadd [#allocation3], 4294967168 }
  0x24   :  { %400 = dma.done.wait [#allocation6], 1536  }
  0x25   :  { %401 = vsyncadd [#allocation6], 4294965760  ;;  %v409_v0 = vmov 0.0   ;;  %vm410_vm0 = vmmov 0   ;;  %v64_v1 = vld [vmem:[#allocation5 + $0x18] sm:$0xff]  ;;  %v63_v2 = vld [vmem:[#allocation5 + $0x10] sm:$0xff] }
  0x26   :  { %276 = vmatprep.subr.mxu0 %v409_v0  ;;  %284 = vmatprep.mubr.msk.f32.mxu0 %vm410_vm0, %v409_v0  ;;  %v154_v3 = vld [vmem:[#allocation7 + $0x38] sm:$0xff]  ;;  %v62_v4 = vld [vmem:[#allocation5 + $0x8] sm:$0xff]  ;;  %v153_v5 = vld [vmem:[#allocation7 + $0x30] sm:$0xff]  ;;  %vm72_vm1 = vcmask 261120   ;;  %vm162_vm2 = vcmask 523264  }
  0x27   :  { %287 = vmatprep.subr.mxu1 %v409_v0  ;;  %303 = vmatprep.mubr.msk.f32.mxu1 %vm410_vm0, %v409_v0  ;;  %v152_v6 = vld [vmem:[#allocation7 + $0x28] sm:$0xff]  ;;  %v61_v7 = vld [vmem:[#allocation5] sm:$0xff]  ;;  %v60_v8 = vld [vmem:[#allocation2] sm:$0xff] }
  0x28   :  { %277 = vmatpush3.msra.mxu0 %v64_v1  ;;  %288 = vmatpush3.msra.mxu1 %v154_v3  ;;  %v151_v9 = vld [vmem:[#allocation7 + $0x20] sm:$0xff]  ;;  %v150_v10 = vld [vmem:[#allocation7 + $0x18] sm:$0xff]  ;;  %v149_v11 = vld [vmem:[#allocation7 + $0x10] sm:$0xff] }
  0x29   :  { %278 = vmatprep.subr.mxu0 %v409_v0  ;;  %289 = vmatprep.subr.mxu1 %v409_v0  ;;  %v148_v12 = vld [vmem:[#allocation7 + $0x8] sm:$0xff]  ;;  %v147_v13 = vld [vmem:[#allocation7] sm:$0xff]  ;;  %v258_v14 = vld [vmem:[%s462_s2] ss:$0 sm:$0xff]  ;;  %s411_s2 = smov [#allocation8]  }
  0x2a   :  { %279 = vmatpush3.msra.mxu0 %v63_v2  ;;  %290 = vmatpush3.msra.mxu1 %v153_v5  ;;  %v260_v19 = vld [vmem:[%s464_s4] ss:$0 sm:$0xff]  ;;  %s248_s11 = sshll.u32 %s411_s2, 4  ;;  %s249_s11 = int_to_ptr.vmem [resolvable:$true] %s248_s11 }
  0x2b   :  { %280 = vmatprep.subr.mxu0 %v409_v0  ;;  %291 = vmatprep.subr.mxu1 %v409_v0  ;;  %s378_s12 = scalar_lea.vmem %s249_s11, 128  ;;  %p383_p2 = scmp.lt.s32.totalorder %s249_s11, %s249_s11 }
  0x2c   :  { %281 = vmatpush3.msra.mxu0 %v62_v4  ;;  %292 = vmatpush3.msra.mxu1 %v152_v6  ;;  %p379_p1 = scmp.ne.s32.totalorder %s249_s11, %s378_s12  ;;  %p384_p3 = scmp.lt.s32.totalorder %s378_s12, %s378_s12 }
  0x2d   :  { %282 = vmatprep.subr.mxu0 %v409_v0  ;;  %293 = vmatprep.subr.mxu1 %v409_v0 }
  0x2e   :  { %283 = vmatpush3.msra.mxu0 %v61_v7  ;;  %294 = vmatpush3.msra.mxu1 %v151_v9  ;;  %p385_p4 = por %p384_p3, %p383_p2 }
  0x2f   :  { %285 = vmatmul.mubr.msk.f32.vlgmr.msra.gmra.mxu0 %vm72_vm1, %v60_v8  ;;  %295 = vmatprep.subr.mxu1 %v409_v0 }
  0x30   :  { %296 = vmatpush3.msra.mxu1 %v150_v10  ;;  %p386_p5 = pnand %p385_p4, %p379_p1 }
  0x31   :  { %297 = vmatprep.subr.mxu1 %v409_v0 }
  0x32   :  { %298 = vmatpush3.msra.mxu1 %v149_v11 }
  0x33   :  { %299 = vmatprep.subr.mxu1 %v409_v0 }
  0x34   :  { %300 = vmatpush3.msra.mxu1 %v148_v12 }
  0x35   :  { %301 = vmatprep.subr.mxu1 %v409_v0 }
  0x36   :  { %302 = vmatpush3.msra.mxu1 %v147_v13 }
  0xef   :  { %v142_v15 = vpop.f32.mrf.mxu0 }
  0xf0   :  { %v143_v16 = vadd.f32 %v258_v14, %v142_v15 }
  0xf1   :  { %v286_v17 = vpop.f32.mrf.mxu0 }
  0xf2   :  { %v146_v18 = vmax.f32 %v143_v16, 0.0 }
  0xf4   :  { %304 = vmatmul.mubr.msk.f32.vlgmr.msra.gmra.mxu1 %vm162_vm2, %v146_v18 }
 0x1b4   :  { %v232_v20 = vpop.f32.mrf.mxu1 }
 0x1b5   :  { %v233_v21 = vadd.f32 %v260_v19, %v232_v20 }
 0x1b6   :  { %v305_v22 = vpop.f32.mrf.mxu1 }
 0x1b7   :  { %v236_v23 = vsub.f32 0.0, %v233_v21 }
 0x1b9   :  { %v237_v24 = vmul.f32 1.442695, %v236_v23 }
 0x1bb   :  { %314 = vpow2.f32 %v237_v24 }
 0x1c8   :  { %v315_v25 = vpop.eup %314 }
 0x1c9   :  { %v239_v26 = vadd.f32 1.0, %v315_v25 }
 0x1cb   :  { %316 = vrcp.f32 %v239_v26 }
 0x1d8   :  { %v317_v27 = vpop.eup %316 }
 0x1d9   :  { %241 = vst [vmem:[#allocation8] sm:$0xff] %v317_v27 }
 0x1da   :  { %389 = shalt.err (!%p386_p5)
}
 0x1db   :  { %251 = dma.vmem_to_hbm [thread:$0]  %s249_s11, 128, %s465_s5, [#allocation4]  }
 0x1dc   :  { %402 = dma.done.wait [#allocation4], 128  }
 0x1dd   :  { %403 = vsyncadd [#allocation4], 4294967168 }
 0x1de   :  { %255 = vsyncpa [#allocation3], 1 }
 0x1df   :  { %256 = vsyncpa [#allocation6], 1 }
 0x1e0   :  { %257 = vsyncpa [#allocation4], 1 }

</bundles_post_ra>
